<compile_context>
chip_gen: v7x
topology: tpu7x:2x2x1
jax: 0.10.0
libtpu: 0.0.40
codegen_flags: <defaults>
</compile_context>

<pallas_src>
import jax
import jax.numpy as jnp
from jax.experimental import pallas as pl
from jax.experimental.pallas import tpu as pltpu

_LANES = 128


def _round_up(x: int, m: int) -> int:
    return ((x + m - 1) // m) * m


def _choose_block_rows(batch: int, in_features: int, itemsize: int) -> int:
    # Real VMEM footprint of a (TB, D) tile is lane-padded: D pads up to at least 128 lanes.
    d_pad = _round_up(max(in_features, 1), _LANES)
    # Double-buffered X tiles kept well inside v7x's 32 MiB scoped VMEM (v5e/v6e have far
    # more headroom, and at this size the kernel is already at the HBM roofline).
    budget_bytes = 24 * 1024 * 1024
    rows_by_vmem = budget_bytes // (2 * itemsize * d_pad)
    tb = (rows_by_vmem // _LANES) * _LANES
    tb = max(_LANES, min(tb, 4096))
    if batch > _LANES:
        # Target >= 2 grid tiles so a 2-TensorCore chip (v7x) can split the batch axis.
        tb = min(tb, _round_up(pl.cdiv(batch, 2), _LANES))
    tb = min(tb, _round_up(batch, _LANES))
    return tb


def _perceptron_kernel(x_ref, w_ref, b_ref, o_ref):
    # x_ref: (TB, D) VMEM, w_ref: (1, D) VMEM, b_ref: (1, 1) SMEM
    # o_ref: (1, TB // 128, 128) VMEM -- lane-dense: batch index on the lane axis.
    n_rows = o_ref.shape[1]                                # TB // 128 (static)
    w = w_ref[...]                                         # (1, D)

    # --- matvec on the MXU, one lane-dense (1, 128) row per 128-row chunk ---
    rows = []
    for k in range(n_rows):                                # static unroll, n_rows <= 32
        x_chunk = x_ref[k * _LANES:(k + 1) * _LANES, :]    # (128, D) static slice
        rows.append(
            jax.lax.dot_general(
                w, x_chunk,
                dimension_numbers=(((1,), (1,)), ((), ())),
                preferred_element_type=jnp.float32,        # (1, 128)
            )
        )
    z = rows[0] if n_rows == 1 else jnp.concatenate(rows, axis=0)   # (n_rows, 128) f32

    # --- epilogue on the lane-dense block: bias + sigmoid (single EUP tanh push) ---
    z = z + b_ref[0, 0]
    p = 0.5 * (jnp.tanh(0.5 * z) + 1.0)                    # == sigmoid(z), no approx recip

    o_ref[0] = p.astype(o_ref.dtype)                       # single full-width store


def single_perceptron_forward(x, w, b):
    """sigmoid(x @ w.T + b).reshape(-1)

    x: (B, D) float32 or bfloat16, w: (1, D) (torch nn.Linear layout), b: (1,).
    Returns (B,) in x.dtype.
    """
    batch, in_features = x.shape
    if x.dtype not in (jnp.float32, jnp.bfloat16):
        x = x.astype(jnp.float32)
    itemsize = jnp.dtype(x.dtype).itemsize

    tb = _choose_block_rows(batch, in_features, itemsize)
    ntiles = pl.cdiv(batch, tb)
    n_rows = tb // _LANES

    w_row = jnp.asarray(w).reshape(1, in_features).astype(x.dtype)   # tiny, stays resident
    b_s = jnp.asarray(b, jnp.float32).reshape(1, 1)

    cost = pl.CostEstimate(
        flops=2 * batch * in_features,
        transcendentals=ntiles * tb,
        bytes_accessed=itemsize * batch * in_features
        + itemsize * ntiles * tb
        + itemsize * in_features
        + 4,
    )

    out = pl.pallas_call(
        _perceptron_kernel,
        out_shape=jax.ShapeDtypeStruct((ntiles, n_rows, _LANES), x.dtype),
        grid_spec=pltpu.PrefetchScalarGridSpec(
            num_scalar_prefetch=0,
            grid=(ntiles,),
            in_specs=[
                pl.BlockSpec((tb, in_features), lambda i: (i, 0)),   # X batch tile
                pl.BlockSpec((1, in_features), lambda i: (0, 0)),    # weight row (resident)
                pl.BlockSpec(memory_space=pltpu.SMEM),               # bias scalar
            ],
            out_specs=pl.BlockSpec((1, n_rows, _LANES), lambda i: (i, 0, 0)),
        ),
        compiler_params=pltpu.CompilerParams(
            dimension_semantics=("parallel",),        # lets v7x shard batch over both TCs
            vmem_limit_bytes=32 * 1024 * 1024,
        ),
        cost_estimate=cost,
    )(x, w_row, b_s)

    # output.view(-1) equivalent; drop the ragged-tile rows past `batch` (never consumed).
    return out.reshape(-1)[:batch]
    # TODO(synk): for tiny D (e.g. 32) on v5e, pack 128//D batch rows per lane-row
    # (wrapper reshape of x to (B*D//128, 128) + block-diagonal weight on the MXU) to fill
    # all 128 lanes on every load and shrink VMEM tiles 4x.


if __name__ == "__main__":
    # Small shapes that still exercise 2 grid tiles + a ragged last block (300 % 256 != 0).
    batch, input_size = 300, 32

    key = jax.random.PRNGKey(0)
    kx, kw, kb = jax.random.split(key, 3)

    # nn.Linear default init: U(-1/sqrt(D), 1/sqrt(D))
    bound = 1.0 / (input_size ** 0.5)
    w = jax.random.uniform(kw, (1, input_size), jnp.float32, -bound, bound)
    b = jax.random.uniform(kb, (1,), jnp.float32, -bound, bound)
    x = jax.random.normal(kx, (batch, input_size), jnp.float32)

    y = jax.block_until_ready(single_perceptron_forward(x, w, b))

    y_ref = jax.nn.sigmoid(x @ w.T + b).reshape(-1)
    assert y.shape == (batch,)
    # Sigmoid is exact (tanh form); residual slack only covers the MXU's default f32
    # matmul precision vs the XLA reference dot.
    assert jnp.allclose(y, y_ref, atol=2e-3, rtol=2e-3), float(jnp.max(jnp.abs(y - y_ref)))

    print("KERNEL_OK")
</pallas_src>

<mosaic_0001>
module attributes {stable_mosaic.version = 11 : i64} {
  func.func @_perceptron_kernel(%arg0: i32, %arg1: memref<256x32xf32, #tpu.memory_space<vmem>>, %arg2: memref<1x32xf32, #tpu.memory_space<vmem>>, %arg3: memref<1x1xf32, #tpu.memory_space<smem>>, %arg4: memref<1x2x128xf32, #tpu.memory_space<vmem>>) attributes {dimension_semantics = [#tpu.dimension_semantics<parallel>], iteration_bounds = array<i64: 2>, scalar_prefetch = 0 : i64, scratch_operands = 0 : i64, tpu.core_type = #tpu.core_type<tc>, window_params = [{transform_indices = @transform_0, window_bounds = array<i64: 256, 32>}, {pipeline_mode = #tpu.pipeline_mode<synchronous>, transform_indices = @transform_1, window_bounds = array<i64: 1, 32>}, {transform_indices = @transform_2, window_bounds = array<i64: 1, 1>}, {transform_indices = @transform_3, window_bounds = array<i64: 1, 2, 128>}]} {
    %c0 = arith.constant 0 : index
    %c0_0 = arith.constant 0 : index
    %0 = vector.load %arg2[%c0, %c0_0] : memref<1x32xf32, #tpu.memory_space<vmem>>, vector<1x32xf32>
    %c0_1 = arith.constant 0 : index
    %c0_2 = arith.constant 0 : index
    %1 = vector.load %arg1[%c0_1, %c0_2] : memref<256x32xf32, #tpu.memory_space<vmem>>, vector<128x32xf32>
    %cst = arith.constant dense<0.000000e+00> : vector<1x128xf32>
    %2 = tpu.matmul %0, %1, %cst {dimension_numbers = #tpu.dot_dimension_numbers<[1], [1], [0], [0], [0, 0, 1, 0], [], []>} : vector<1x32xf32>, vector<128x32xf32>, vector<1x128xf32> -> vector<1x128xf32>
    %c128 = arith.constant 128 : index
    %c0_3 = arith.constant 0 : index
    %3 = vector.load %arg1[%c128, %c0_3] : memref<256x32xf32, #tpu.memory_space<vmem>>, vector<128x32xf32>
    %cst_4 = arith.constant dense<0.000000e+00> : vector<1x128xf32>
    %4 = tpu.matmul %0, %3, %cst_4 {dimension_numbers = #tpu.dot_dimension_numbers<[1], [1], [0], [0], [0, 0, 1, 0], [], []>} : vector<1x32xf32>, vector<128x32xf32>, vector<1x128xf32> -> vector<1x128xf32>
    %5 = tpu.concatenate %2, %4 in 0 : vector<1x128xf32>, vector<1x128xf32> -> vector<2x128xf32>
    %c0_5 = arith.constant 0 : index
    %c0_6 = arith.constant 0 : index
    %6 = memref.load %arg3[%c0_5, %c0_6] : memref<1x1xf32, #tpu.memory_space<smem>>
    %7 = vector.broadcast %6 : f32 to vector<2x128xf32>
    %8 = arith.addf %5, %7 : vector<2x128xf32>
    %cst_7 = arith.constant 5.000000e-01 : f32
    %9 = vector.broadcast %cst_7 : f32 to vector<2x128xf32>
    %10 = arith.mulf %9, %8 : vector<2x128xf32>
    %11 = math.tanh %10 : vector<2x128xf32>
    %cst_8 = arith.constant 1.000000e+00 : f32
    %12 = vector.broadcast %cst_8 : f32 to vector<2x128xf32>
    %13 = arith.addf %11, %12 : vector<2x128xf32>
    %cst_9 = arith.constant 5.000000e-01 : f32
    %14 = vector.broadcast %cst_9 : f32 to vector<2x128xf32>
    %15 = arith.mulf %14, %13 : vector<2x128xf32>
    %c0_10 = arith.constant 0 : index
    %c0_11 = arith.constant 0 : index
    %c0_12 = arith.constant 0 : index
    %16 = vector.load %arg4[%c0_10, %c0_11, %c0_12] : memref<1x2x128xf32, #tpu.memory_space<vmem>>, vector<1x2x128xf32>
    %17 = vector.shape_cast %16 : vector<1x2x128xf32> to vector<2x128xf32>
    %18 = vector.shape_cast %15 : vector<2x128xf32> to vector<1x2x128xf32>
    tpu.vector_store %arg4[%c0_10, %c0_11, %c0_12], %18 {strides = array<i32>} : memref<1x2x128xf32, #tpu.memory_space<vmem>>, vector<1x2x128xf32>,
    return
  }
  func.func @transform_0(%arg0: i32) -> (i32, i32) {
    %c0_i32 = arith.constant 0 : i32
    %c0_i32_0 = arith.constant 0 : i32
    return %arg0, %c0_i32 : i32, i32
  }
  func.func @transform_1(%arg0: i32) -> (i32, i32) {
    %c0_i32 = arith.constant 0 : i32
    %c0_i32_0 = arith.constant 0 : i32
    %c0_i32_1 = arith.constant 0 : i32
    return %c0_i32, %c0_i32_0 : i32, i32
  }
  func.func @transform_2(%arg0: i32) -> (i32, i32) {
    %c0_i32 = arith.constant 0 : i32
    %c0_i32_0 = arith.constant 0 : i32
    %c0_i32_1 = arith.constant 0 : i32
    return %c0_i32, %c0_i32_0 : i32, i32
  }
  func.func @transform_3(%arg0: i32) -> (i32, i32, i32) {
    %c0_i32 = arith.constant 0 : i32
    %c0_i32_0 = arith.constant 0 : i32
    %c0_i32_1 = arith.constant 0 : i32
    return %arg0, %c0_i32, %c0_i32_0 : i32, i32, i32
  }
}

</mosaic_0001>

<bundles_post_ra>
// kernel: tpu_custom_call.1
= control target key start
LH: loop header
LB: loop body
LE: loop exit
PB: predicated region body
PF: predicated region fallthrough
CT: control target
= control target key end

     0   :  { %s1091_s0 = inlined_call_operand.vmem [shape: f32[300,32], index: 0, kind: input, shape index: {}]   ;;  %s1092_s1 = inlined_call_operand.vmem [shape: f32[1,32], index: 1, kind: input, shape index: {}]   ;;  %s1093_s2 = inlined_call_operand.<no memory space> [shape: f32[1,1], index: 2, kind: input, shape index: {}]   ;;  %s1094_s3 = inlined_call_operand.hbm [shape: f32[2,2,128], index: 3, kind: output, shape index: {}]  }
   0x1   :  { %8 = sst [smem:[#allocation2]] %s1093_s2 }
   0x2   :  { %9 = vsyncpa [#allocation4], 0 }
   0x3   :  { %11 = vsyncpa [#allocation4 + $0x1], 0  ;;  %s899_s14 = smov 0   ;;  %s901_s15 = smov 0  }
   0x4   :  { %s903_s16 = smov 0   ;;  %s905_s17 = smov 0  }
   0x5 LB: > { %s550_s2 = sadd.s32 4294967295, %s870_s17   ;;  %s551_s18 = sadd.s32 4294967294, %s870_s17   ;;  %s870_s17 = sphi %s905_s17, %s1102_s17   ;;  %s866_s16 = sphi %s903_s16, %s1101_s16   ;;  %s862_s15 = sphi %s901_s15, %s1100_s15   ;;  %s858_s14 = sphi %s899_s14, %s1099_s14  }
   0x6   : > { %s922_s19 = sadd.s32 1, %s870_s17   ;;  %s92_s20 = sadd.s32 1, %s866_s16 }
   0x7   : > { %s89_s21 = ssub.s32 %s870_s17, %s922_s19  ;;  %p102_p0 = scmp.ne.s32.totalorder %s866_s16, %s862_s15 }
   0x8   : > { %p90_p1 = scmp.eq.s32.totalorder %s89_s21, 0  ;;  %p103_p2 = scmp.eq.s32.totalorder %s550_s2, 1 }
   0x9   : > { %p108_p3 = scmp.ne.s32.totalorder %s862_s15, %s858_s14  ;;  %p109_p4 = scmp.eq.s32.totalorder %s551_s18, 1 }
   0xa   : > { %s932_s22 = scalar_select %p90_p1, %s866_s16, %s92_s20  }
   0xb   : > { %p934_p5 = por %p103_p2, %p102_p0  ;;  %p938_p6 = por %p109_p4, %p108_p3 }
   0xc   : > { %p554_p7 = scmp.ge.s32.totalorder %s870_s17, 1  ;;  %p150_p8 = scmp.lt.s32.totalorder %s870_s17, 3 }
   0xe   : > { %p151_p9 = pnand %p554_p7, %p150_p8 }
   0xf   : > { %s944_s25 = sshll.u32 (!%p151_p9), %s550_s2, 5  ;;  %v872_v0 = vmov (!%p151_p9), 0.0|0.0   ;;  %vm873_vm0 = vmmov (!%p151_p9), 0   ;;  %v874_v1 = vmov (!%p151_p9), 0.0   ;;  %vm209_vm1 = vcmask (!%p151_p9), 261120   ;;  %s470_s6 = sld [smem:[#allocation2]] (!%p151_p9) }
  0x10   : > { %154 = sbr.rel (%p151_p9) target bundleno = 341 (0x155), region = 32  ;;  %732 = vmatprep.subr.bf16.mxu1 (!%p151_p9), %v872_v0  ;;  %700 = vmatprep.subr.bf16.mxu0 (!%p151_p9), %v872_v0  ;;  %p183_p10 = scmp.lt.s32.totalorder (!%p151_p9), %s944_s25, 37  ;;  %vm957_vm2 = vmpackc.low (!%p151_p9), %vm209_vm1, %vm209_vm1  ;;  %v192_v51 = vld [vmem:[%s1092_s1] sm:$0x1] (!%p151_p9)  ;;  %vm468_vm3 = vcmask (!%p151_p9), 1040384  }
  0x11   : > { %697 = vmatprep.mubr.msk.f32.mxu1 (!%p151_p9), %vm873_vm0, %v874_v1  ;;  %662 = vmatprep.mubr.msk.f32.mxu0 (!%p151_p9), %vm873_vm0, %v874_v1  ;;  %s175_s7 = sand.u32 (!%p151_p9), 1, %s862_s15   ;;  %s1049_s13 = scalar_lea.hbm (!%p151_p9), %s1094_s3, %s944_s25 }
  0x12   : > { %s555_s8 = sshll.u32 (!%p151_p9), %s175_s7, 1  ;;  %s479_s2 = scalar_lea.sflag (!%p151_p9), [#allocation4], %s175_s7 }
  0x13   : > { %s177_s9 = scalar_lea.vmem (!%p151_p9), [#allocation3], %s555_s8  ;;  %s875_s20 = smov (!%p151_p9), [#allocation3]  }
  0x14   : > { %s492_s10 = sshll.u32 (!%p151_p9), %s177_s9, 4  ;;  %s812_s21 = sshll.u32 (!%p151_p9), %s875_s20, 4  ;;  %s1051_s10 = int_to_ptr.vmem [resolvable:$true] %s492_s10  ;;  %s813_s21 = int_to_ptr.vmem [resolvable:$false] %s812_s21 }
  0x15   : > { %v471_v55 = vstv (!%p151_p9), %s470_s6  ;;  %s808_s18 = scalar_lea.vmem (!%p151_p9), %s1051_s10, 32  ;;  %p815_p0 = scmp.lt.s32.totalorder (!%p151_p9), %s1051_s10, %s813_s21 }
  0x16   : > { %p809_p11 = scmp.ne.s32.totalorder (!%p151_p9), %s1051_s10, %s808_s18 }
  0x17   : > { %s184_s26 = scalar_select %p183_p10, %s944_s25, 37 }
  0x18   : > { %p810_p12 = pnand %p809_p11, %p934_p5 }
  0x19   : > { %s557_s27 = sshll.u32 %s184_s26, 3  ;;  %s814_s26 = scalar_lea.vmem %s813_s21, 64 }
  0x1a   : > { %s953_s30 = scalar_lea.vmem %s1091_s0, %s557_s27  ;;  %p811_p13 = pneg %p810_p12 }
  0x1b   : > { %v331_v3 = vld [vmem:[%s953_s30 + $0x80] sm:$0xff]  ;;  %v332_v4 = vld [vmem:[%s953_s30 + $0x88] sm:$0xff]  ;;  %v333_v9 = vld [vmem:[%s953_s30 + $0x90] sm:$0xff]  ;;  %p816_p1 = scmp.lt.s32.totalorder %s814_s26, %s808_s18 }
  0x1c   : > { %v193_v5 = vld [vmem:[%s953_s30] sm:$0xff]  ;;  %v733_v6 = vpack.c.bf16 %v332_v4, %v331_v3  ;;  %v194_v7 = vld [vmem:[%s953_s30 + $0x8] sm:$0xff]  ;;  %v334_v10 = vld [vmem:[%s953_s30 + $0x98] sm:$0xff] }
  0x1d   : > { %v701_v8 = vpack.c.bf16 %v194_v7, %v193_v5  ;;  %v195_v11 = vld [vmem:[%s953_s30 + $0x10] sm:$0xff]  ;;  %v196_v12 = vld [vmem:[%s953_s30 + $0x18] sm:$0xff]  ;;  %v737_v13 = vpack.c.bf16 %v334_v10, %v333_v9  ;;  %v335_v15 = vld [vmem:[%s953_s30 + $0xa0] sm:$0xff]  ;;  %p817_p2 = por %p816_p1, %p815_p0 }
  0x1e   : > { %735 = vmatpush3.bf16.xpose.msk.msra.mxu1 %vm957_vm2, %v733_v6  ;;  %v705_v14 = vpack.c.bf16 %v196_v12, %v195_v11  ;;  %v336_v16 = vld [vmem:[%s953_s30 + $0xa8] sm:$0xff]  ;;  %v197_v17 = vld [vmem:[%s953_s30 + $0x20] sm:$0xff]  ;;  %v337_v21 = vld [vmem:[%s953_s30 + $0xb0] sm:$0xff] }
  0x1f   : > { %703 = vmatpush3.bf16.xpose.msk.msra.mxu0 %vm957_vm2, %v701_v8  ;;  %736 = vmatprep.subr.bf16.mxu1 %v872_v0  ;;  %v198_v18 = vld [vmem:[%s953_s30 + $0x28] sm:$0xff]  ;;  %v741_v19 = vpack.c.bf16 %v336_v16, %v335_v15  ;;  %v338_v22 = vld [vmem:[%s953_s30 + $0xb8] sm:$0xff]  ;;  %v199_v23 = vld [vmem:[%s953_s30 + $0x30] sm:$0xff]  ;;  %p818_p3 = pnand %p817_p2, %p811_p13 }
  0x20   : > { %704 = vmatprep.subr.bf16.mxu0 %v872_v0  ;;  %v709_v20 = vpack.c.bf16 %v198_v18, %v197_v17  ;;  %v200_v24 = vld [vmem:[%s953_s30 + $0x38] sm:$0xff]  ;;  %v745_v25 = vpack.c.bf16 %v338_v22, %v337_v21  ;;  %v339_v27 = vld [vmem:[%s953_s30 + $0xc0] sm:$0xff]  ;;  %v340_v28 = vld [vmem:[%s953_s30 + $0xc8] sm:$0xff] }
  0x21   : > { %v713_v26 = vpack.c.bf16 %v200_v24, %v199_v23  ;;  %v201_v29 = vld [vmem:[%s953_s30 + $0x40] sm:$0xff]  ;;  %v202_v30 = vld [vmem:[%s953_s30 + $0x48] sm:$0xff]  ;;  %v749_v31 = vpack.c.bf16 %v340_v28, %v339_v27  ;;  %v341_v33 = vld [vmem:[%s953_s30 + $0xd0] sm:$0xff] }
  0x22   : > { %v717_v32 = vpack.c.bf16 %v202_v30, %v201_v29  ;;  %v342_v34 = vld [vmem:[%s953_s30 + $0xd8] sm:$0xff]  ;;  %v203_v35 = vld [vmem:[%s953_s30 + $0x50] sm:$0xff]  ;;  %v343_v39 = vld [vmem:[%s953_s30 + $0xe0] sm:$0xff] }
  0x23   : > { %v204_v36 = vld [vmem:[%s953_s30 + $0x58] sm:$0xff]  ;;  %v753_v37 = vpack.c.bf16 %v342_v34, %v341_v33  ;;  %v344_v40 = vld [vmem:[%s953_s30 + $0xe8] sm:$0xff]  ;;  %v205_v41 = vld [vmem:[%s953_s30 + $0x60] sm:$0xff] }
  0x24   : > { %v721_v38 = vpack.c.bf16 %v204_v36, %v203_v35  ;;  %v206_v42 = vld [vmem:[%s953_s30 + $0x68] sm:$0xff]  ;;  %v757_v43 = vpack.c.bf16 %v344_v40, %v343_v39  ;;  %v345_v45 = vld [vmem:[%s953_s30 + $0xf0] sm:$0xff]  ;;  %v346_v46 = vld [vmem:[%s953_s30 + $0xf8] sm:$0xff] }
  0x25   : > { %v725_v44 = vpack.c.bf16 %v206_v42, %v205_v41  ;;  %v207_v47 = vld [vmem:[%s953_s30 + $0x70] sm:$0xff]  ;;  %v208_v48 = vld [vmem:[%s953_s30 + $0x78] sm:$0xff]  ;;  %v761_v49 = vpack.c.bf16 %v346_v46, %v345_v45 }
  0x26   : > { %739 = vmatpush3.bf16.xpose.msk.msra.mxu1 %vm957_vm2, %v737_v13  ;;  %v729_v50 = vpack.c.bf16 %v208_v48, %v207_v47 }
  0x27   : > { %707 = vmatpush3.bf16.xpose.msk.msra.mxu0 %vm957_vm2, %v705_v14  ;;  %740 = vmatprep.subr.bf16.mxu1 %v872_v0 }
  0x28   : > { %708 = vmatprep.subr.bf16.mxu0 %v872_v0 }
  0x2e   : > { %743 = vmatpush3.bf16.xpose.msk.msra.mxu1 %vm957_vm2, %v741_v19 }
  0x2f   : > { %711 = vmatpush3.bf16.xpose.msk.msra.mxu0 %vm957_vm2, %v709_v20  ;;  %744 = vmatprep.subr.bf16.mxu1 %v872_v0 }
  0x30   : > { %712 = vmatprep.subr.bf16.mxu0 %v872_v0 }
  0x36   : > { %747 = vmatpush3.bf16.xpose.msk.msra.mxu1 %vm957_vm2, %v745_v25 }
  0x37   : > { %715 = vmatpush3.bf16.xpose.msk.msra.mxu0 %vm957_vm2, %v713_v26  ;;  %748 = vmatprep.subr.bf16.mxu1 %v872_v0 }
  0x38   : > { %716 = vmatprep.subr.bf16.mxu0 %v872_v0 }
  0x3e   : > { %751 = vmatpush3.bf16.xpose.msk.msra.mxu1 %vm957_vm2, %v749_v31 }
  0x3f   : > { %719 = vmatpush3.bf16.xpose.msk.msra.mxu0 %vm957_vm2, %v717_v32  ;;  %752 = vmatprep.subr.bf16.mxu1 %v872_v0 }
  0x40   : > { %720 = vmatprep.subr.bf16.mxu0 %v872_v0 }
  0x46   : > { %755 = vmatpush3.bf16.xpose.msk.msra.mxu1 %vm957_vm2, %v753_v37 }
  0x47   : > { %723 = vmatpush3.bf16.xpose.msk.msra.mxu0 %vm957_vm2, %v721_v38  ;;  %756 = vmatprep.subr.bf16.mxu1 %v872_v0 }
  0x48   : > { %724 = vmatprep.subr.bf16.mxu0 %v872_v0 }
  0x4e   : > { %759 = vmatpush3.bf16.xpose.msk.msra.mxu1 %vm957_vm2, %v757_v43 }
  0x4f   : > { %727 = vmatpush3.bf16.xpose.msk.msra.mxu0 %vm957_vm2, %v725_v44  ;;  %760 = vmatprep.subr.bf16.mxu1 %v872_v0 }
  0x50   : > { %728 = vmatprep.subr.bf16.mxu0 %v872_v0 }
  0x56   : > { %763 = vmatpush3.bf16.xpose.msk.msra.mxu1 %vm957_vm2, %v761_v49 }
  0x57   : > { %731 = vmatpush3.bf16.xpose.msk.msra.mxu0 %vm957_vm2, %v729_v50 }
  0x5d   : > { %698 = vmatmul.mubr.msk.f32.vlgmr.msra.gmra.mrb[0].mxu1 %vm209_vm1, %v192_v51 }
  0x5e   : > { %663 = vmatmul.mubr.msk.f32.vlgmr.msra.gmra.mrb[0].mxu0 %vm209_vm1, %v192_v51 }
 0x130   : > { %v461_v52 = vpop.f32.mrb[0].mxu1 }
 0x131   : > { %v466_v53 = vrot.slane %v461_v52, 7  ;;  %v327_v54 = vpop.f32.mrb[0].mxu0  ;;  %v699_v56 = vpop.f32.mrb[1].mxu1 }
 0x132   : > { %v664_v57 = vpop.f32.mrb[1].mxu0 }
 0x133   : > { %v469_v58 = vsel %vm468_vm3, %v327_v54, %v466_v53 }
 0x134   : > { %v472_v59 = vadd.f32 %v471_v55, %v469_v58 }
 0x136   : > { %v473_v60 = vmul.f32 0.5, %v472_v59 }
 0x138   : > { %806 = vtanh.f32 %v473_v60 }
 0x142   : > { %v807_v61 = vpop.eup %806 }
 0x143   : > { %v475_v62 = vadd.f32 1.0, %v807_v61 }
 0x145   : > { %v476_v63 = vmul.f32 0.5, %v475_v62 }
 0x147   : > { %477 = vst [vmem:[%s177_s9] sm:$0x3] %v476_v63 }
 0x148   : > { %821 = shalt.err (!%p818_p3)
}
 0x149   : > { %s822_s25 = scalar_lea.hbm %s1049_s13, 32  ;;  %s826_s29 = scalar_lea.hbm %s1094_s3, 64 }
 0x14a   : > { %p823_p4 = scmp.ne.s32.totalorder %s1049_s13, %s822_s25  ;;  %p827_p9 = scmp.lt.u32.totalorder %s1049_s13, %s1094_s3 }
 0x14b   : > { %p828_p10 = scmp.lt.u32.totalorder %s826_s29, %s822_s25  ;;  %p830_p12 = scmp.lt.u32.totalorder %s822_s25, %s1049_s13 }
 0x14c   : > { %p824_p7 = pnand %p823_p4, %p934_p5 }
 0x14d   : > { %p829_p11 = por %p828_p10, %p827_p9 }
 0x14e   : > { %p825_p8 = pneg %p824_p7 }
 0x14f   : > { %p831_p13 = por %p830_p12, %p829_p11 }
 0x151   : > { %p832_p0 = pnand %p831_p13, %p825_p8 }
 0x153   : > { %835 = shalt.err (!%p832_p0)
}
 0x154   : > { %764 = dma.vmem_to_hbm [thread:$0]  (%p934_p5), %s1051_s10, 32, %s1049_s13, %s479_s2  }
 0x155 PF: > { %p770_p1 = scmp.ge.s32.totalorder %s870_s17, 2  ;;  %s504_s5 = sand.u32 1, %s858_s14  }
 0x156   : > { %s505_s6 = scalar_lea.sflag [#allocation4], %s504_s5 }
 0x157   : > { %p767_p2 = pnand %p770_p1, %p938_p6 }
 0x159   : > { %853 = dma.done.wait (!%p767_p2), %s505_s6, 32  }
 0x15a   : > { %855 = vsyncadd (!%p767_p2), %s505_s6, 4294967264  ;;  %p14_p3 = scmp.ge.s32.totalorder %s922_s19, 4   ;;  %s1099_s14 = smov %s862_s15 }
 0x15b   : > { %s1100_s15 = smov %s866_s16  ;;  %s1101_s16 = smov %s932_s22 }
 0x15c   : > { %s1102_s17 = smov %s922_s19  ;;  %16 = sbr.rel (!%p14_p3) target bundleno = 5 (0x5), region = 67 }
 0x163   :  { %510 = vsyncpa [#allocation4], 1 }
 0x164   :  { %512 = vsyncpa [#allocation4 + $0x1], 1 }

</bundles_post_ra>
